<compile_context>
chip_gen: v7x
topology: tpu7x:2x2x1
jax: 0.10.0
libtpu: 0.0.40
codegen_flags: <defaults>
</compile_context>

<pallas_src>
import jax
import jax.numpy as jnp
from jax.experimental import pallas as pl
from jax.experimental.pallas import tpu as pltpu

_BALIGN = 8 * 128  # full (sublane, lane) packing granularity for f32


def _cdiv(a, b):
    return (a + b - 1) // b


def _round_up(n, m):
    return _cdiv(n, m) * m


def _fir_kernel(x_ref, w1_ref, b1_ref, w2_ref, b2_ref, o_ref):
    """One batch tile, batch packed onto (sublane, lane).

    x_ref : (3, tb//128, 128)  f32 VMEM   -- input features, batch on sublanes+lanes
    w1_ref: (5, 3)             f32 SMEM   -- PyTorch (out, in) layout
    b1_ref: (5,)               f32 SMEM
    w2_ref: (2, 5)             f32 SMEM
    b2_ref: (2,)               f32 SMEM
    o_ref : (2, tb//128, 128)  f32 VMEM   -- output, batch on sublanes+lanes
    """
    # Full (tb//128, 128) tiles: every vreg is 100% utilized, loads/stores are unmasked.
    x0 = x_ref[0]
    x1 = x_ref[1]
    x2 = x_ref[2]

    # Layer 1 (3 -> 5) + ReLU as 15 scalar-broadcast FMAs on the VPU.
    hs = []
    for j in range(5):
        acc = w1_ref[j, 0] * x0
        acc = acc + w1_ref[j, 1] * x1
        acc = acc + w1_ref[j, 2] * x2
        hs.append(jnp.maximum(acc + b1_ref[j], 0.0))

    # Layer 2 (5 -> 2) + sigmoid.  sigmoid(y) = 0.5*tanh(0.5*y) + 0.5 (exact identity);
    # tanh lowers to the EUP slot instead of a multi-op VALU divide.
    for k in range(2):
        acc = w2_ref[k, 0] * hs[0]
        for j in range(1, 5):
            acc = acc + w2_ref[k, j] * hs[j]
        y = acc + b2_ref[k]
        o_ref[k] = 0.5 * jnp.tanh(0.5 * y) + 0.5


def fir_model_forward_feature_major(x_t, w1, b1, w2, b2, *, tb_max=262144):
    """Feature-major fast path.

    x_t: (3, B) f32 (batch on the fast axis).  Returns (2, B) f32.
    No wrapper transposes: ideal HBM traffic of 20 B/row.
    """
    x_t = jnp.asarray(x_t, jnp.float32)
    w1 = jnp.asarray(w1, jnp.float32)   # (5, 3)
    b1 = jnp.asarray(b1, jnp.float32)   # (5,)
    w2 = jnp.asarray(w2, jnp.float32)   # (2, 5)
    b2 = jnp.asarray(b2, jnp.float32)   # (2,)

    B = x_t.shape[1]
    tb_max = max(_BALIGN, _round_up(tb_max, _BALIGN))

    # Batch padded to full (8,128) packing; choose a tile count that (a) respects tb_max
    # and (b) gives >= 2 grid steps when possible so v7x megacore shards the batch.
    b_pad0 = _round_up(max(B, 1), _BALIGN)
    n_tiles = _cdiv(b_pad0, tb_max)
    if b_pad0 >= 2 * _BALIGN:
        n_tiles = max(n_tiles, 2)
    tb = _round_up(_cdiv(b_pad0, n_tiles), _BALIGN)
    b_pad = n_tiles * tb

    if b_pad != B:
        x_t = jnp.pad(x_t, ((0, 0), (0, b_pad - B)))

    # Free row-major reshape: pack batch onto (sublane, lane).
    x_p = x_t.reshape(3, b_pad // 128, 128)

    rows = tb // 128  # multiple of 8 -> full sublane tiles

    # Tiny weights / biases: whole arrays in SMEM, read as scalars inside the kernel.
    smem_spec = pl.BlockSpec(memory_space=pltpu.MemorySpace.SMEM)

    out_p = pl.pallas_call(
        _fir_kernel,
        out_shape=jax.ShapeDtypeStruct((2, b_pad // 128, 128), jnp.float32),
        grid=(n_tiles,),
        in_specs=[
            pl.BlockSpec((3, rows, 128), lambda i: (0, i, 0)),  # x tile, double-buffered
            smem_spec,   # w1
            smem_spec,   # b1
            smem_spec,   # w2
            smem_spec,   # b2
        ],
        out_specs=pl.BlockSpec((2, rows, 128), lambda i: (0, i, 0)),
        compiler_params=pltpu.CompilerParams(
            dimension_semantics=("parallel",),          # batch tiles are independent
            vmem_limit_bytes=32 * 1024 * 1024,          # safe on v5e/v6e and v7x (64 MiB phys)
        ),
        cost_estimate=pl.CostEstimate(
            flops=50 * b_pad,                           # 2*(3*5) + 2*(5*2) per row
            transcendentals=2 * b_pad,                  # one tanh per output element
            bytes_accessed=(3 + 2) * 4 * b_pad,         # f32 in + out per row
        ),
    )(x_p, w1, b1, w2, b2)

    return out_p.reshape(2, b_pad)[:, :B]


def fir_model_forward(x, w1, b1, w2, b2, *, tb_max=262144):
    """PyTorch-convention wrapper: x (B, 3) f32 -> (B, 2) f32.

    w1: (5, 3); b1: (5,); w2: (2, 5); b2: (2,)  -- nn.Linear layouts.
    """
    x = jnp.asarray(x, jnp.float32)
    # TODO(synk): these two XLA transposes are extra HBM passes; keep activations
    # feature-major and call fir_model_forward_feature_major to avoid them.
    y_t = fir_model_forward_feature_major(x.T, w1, b1, w2, b2, tb_max=tb_max)
    return y_t.T


if __name__ == "__main__":
    key = jax.random.PRNGKey(0)
    kx, k1, k2, k3, k4 = jax.random.split(key, 5)

    B = 2500
    x = jax.random.normal(kx, (B, 3), dtype=jnp.float32)

    # Deterministic parameter init (shapes from nn.Linear(3,5) and nn.Linear(5,2)).
    w1 = jax.random.normal(k1, (5, 3), dtype=jnp.float32) * 0.5
    b1 = jax.random.normal(k2, (5,), dtype=jnp.float32) * 0.1
    w2 = jax.random.normal(k3, (2, 5), dtype=jnp.float32) * 0.5
    b2 = jax.random.normal(k4, (2,), dtype=jnp.float32) * 0.1

    # Pure-JAX reference.
    def ref_fn(xx):
        return jax.nn.sigmoid(jnp.maximum(xx @ w1.T + b1, 0.0) @ w2.T + b2)

    # Small tile -> 3 grid steps: exercises tiling, padding and pipelining.
    out = fir_model_forward(x, w1, b1, w2, b2, tb_max=1024)
    out = jax.block_until_ready(out)
    assert out.shape == (B, 2)
    assert jnp.allclose(out, ref_fn(x), atol=1e-5, rtol=1e-5)

    # Default (large-tile) path with a tiny batch: single grid step + padding.
    out2 = jax.block_until_ready(fir_model_forward(x[:7], w1, b1, w2, b2))
    assert out2.shape == (7, 2)
    assert jnp.allclose(out2, ref_fn(x[:7]), atol=1e-5, rtol=1e-5)

    print("KERNEL_OK")
</pallas_src>

<mosaic_0001>
module attributes {stable_mosaic.version = 11 : i64} {
  func.func @_fir_kernel(%arg0: i32, %arg1: memref<3x8x128xf32, #tpu.memory_space<vmem>>, %arg2: memref<5x3xf32, #tpu.memory_space<smem>>, %arg3: memref<5xf32, #tpu.memory_space<smem>>, %arg4: memref<2x5xf32, #tpu.memory_space<smem>>, %arg5: memref<2xf32, #tpu.memory_space<smem>>, %arg6: memref<2x8x128xf32, #tpu.memory_space<vmem>>) attributes {dimension_semantics = [#tpu.dimension_semantics<parallel>], iteration_bounds = array<i64: 3>, scalar_prefetch = 0 : i64, scratch_operands = 0 : i64, tpu.core_type = #tpu.core_type<tc>, window_params = [{transform_indices = @transform_0, window_bounds = array<i64: 3, 8, 128>}, {transform_indices = @transform_1, window_bounds = array<i64: 5, 3>}, {transform_indices = @transform_2, window_bounds = array<i64: 5>}, {transform_indices = @transform_3, window_bounds = array<i64: 2, 5>}, {transform_indices = @transform_4, window_bounds = array<i64: 2>}, {transform_indices = @transform_5, window_bounds = array<i64: 2, 8, 128>}]} {
    %c0 = arith.constant 0 : index
    %c0_0 = arith.constant 0 : index
    %c0_1 = arith.constant 0 : index
    %0 = vector.load %arg1[%c0, %c0_0, %c0_1] : memref<3x8x128xf32, #tpu.memory_space<vmem>>, vector<1x8x128xf32>
    %1 = vector.shape_cast %0 : vector<1x8x128xf32> to vector<8x128xf32>
    %c1 = arith.constant 1 : index
    %c0_2 = arith.constant 0 : index
    %c0_3 = arith.constant 0 : index
    %2 = vector.load %arg1[%c1, %c0_2, %c0_3] : memref<3x8x128xf32, #tpu.memory_space<vmem>>, vector<1x8x128xf32>
    %3 = vector.shape_cast %2 : vector<1x8x128xf32> to vector<8x128xf32>
    %c2 = arith.constant 2 : index
    %c0_4 = arith.constant 0 : index
    %c0_5 = arith.constant 0 : index
    %4 = vector.load %arg1[%c2, %c0_4, %c0_5] : memref<3x8x128xf32, #tpu.memory_space<vmem>>, vector<1x8x128xf32>
    %5 = vector.shape_cast %4 : vector<1x8x128xf32> to vector<8x128xf32>
    %c0_6 = arith.constant 0 : index
    %c0_7 = arith.constant 0 : index
    %6 = memref.load %arg2[%c0_6, %c0_7] : memref<5x3xf32, #tpu.memory_space<smem>>
    %7 = vector.broadcast %6 : f32 to vector<8x128xf32>
    %8 = arith.mulf %7, %1 : vector<8x128xf32>
    %c0_8 = arith.constant 0 : index
    %c1_9 = arith.constant 1 : index
    %9 = memref.load %arg2[%c0_8, %c1_9] : memref<5x3xf32, #tpu.memory_space<smem>>
    %10 = vector.broadcast %9 : f32 to vector<8x128xf32>
    %11 = arith.mulf %10, %3 : vector<8x128xf32>
    %12 = arith.addf %8, %11 : vector<8x128xf32>
    %c0_10 = arith.constant 0 : index
    %c2_11 = arith.constant 2 : index
    %13 = memref.load %arg2[%c0_10, %c2_11] : memref<5x3xf32, #tpu.memory_space<smem>>
    %14 = vector.broadcast %13 : f32 to vector<8x128xf32>
    %15 = arith.mulf %14, %5 : vector<8x128xf32>
    %16 = arith.addf %12, %15 : vector<8x128xf32>
    %c0_12 = arith.constant 0 : index
    %17 = memref.load %arg3[%c0_12] : memref<5xf32, #tpu.memory_space<smem>>
    %18 = vector.broadcast %17 : f32 to vector<8x128xf32>
    %19 = arith.addf %16, %18 : vector<8x128xf32>
    %cst = arith.constant 0.000000e+00 : f32
    %20 = vector.broadcast %cst : f32 to vector<8x128xf32>
    %21 = arith.maximumf %19, %20 : vector<8x128xf32>
    %c1_13 = arith.constant 1 : index
    %c0_14 = arith.constant 0 : index
    %22 = memref.load %arg2[%c1_13, %c0_14] : memref<5x3xf32, #tpu.memory_space<smem>>
    %23 = vector.broadcast %22 : f32 to vector<8x128xf32>
    %24 = arith.mulf %23, %1 : vector<8x128xf32>
    %c1_15 = arith.constant 1 : index
    %c1_16 = arith.constant 1 : index
    %25 = memref.load %arg2[%c1_15, %c1_16] : memref<5x3xf32, #tpu.memory_space<smem>>
    %26 = vector.broadcast %25 : f32 to vector<8x128xf32>
    %27 = arith.mulf %26, %3 : vector<8x128xf32>
    %28 = arith.addf %24, %27 : vector<8x128xf32>
    %c1_17 = arith.constant 1 : index
    %c2_18 = arith.constant 2 : index
    %29 = memref.load %arg2[%c1_17, %c2_18] : memref<5x3xf32, #tpu.memory_space<smem>>
    %30 = vector.broadcast %29 : f32 to vector<8x128xf32>
    %31 = arith.mulf %30, %5 : vector<8x128xf32>
    %32 = arith.addf %28, %31 : vector<8x128xf32>
    %c1_19 = arith.constant 1 : index
    %33 = memref.load %arg3[%c1_19] : memref<5xf32, #tpu.memory_space<smem>>
    %34 = vector.broadcast %33 : f32 to vector<8x128xf32>
    %35 = arith.addf %32, %34 : vector<8x128xf32>
    %cst_20 = arith.constant 0.000000e+00 : f32
    %36 = vector.broadcast %cst_20 : f32 to vector<8x128xf32>
    %37 = arith.maximumf %35, %36 : vector<8x128xf32>
    %c2_21 = arith.constant 2 : index
    %c0_22 = arith.constant 0 : index
    %38 = memref.load %arg2[%c2_21, %c0_22] : memref<5x3xf32, #tpu.memory_space<smem>>
    %39 = vector.broadcast %38 : f32 to vector<8x128xf32>
    %40 = arith.mulf %39, %1 : vector<8x128xf32>
    %c2_23 = arith.constant 2 : index
    %c1_24 = arith.constant 1 : index
    %41 = memref.load %arg2[%c2_23, %c1_24] : memref<5x3xf32, #tpu.memory_space<smem>>
    %42 = vector.broadcast %41 : f32 to vector<8x128xf32>
    %43 = arith.mulf %42, %3 : vector<8x128xf32>
    %44 = arith.addf %40, %43 : vector<8x128xf32>
    %c2_25 = arith.constant 2 : index
    %c2_26 = arith.constant 2 : index
    %45 = memref.load %arg2[%c2_25, %c2_26] : memref<5x3xf32, #tpu.memory_space<smem>>
    %46 = vector.broadcast %45 : f32 to vector<8x128xf32>
    %47 = arith.mulf %46, %5 : vector<8x128xf32>
    %48 = arith.addf %44, %47 : vector<8x128xf32>
    %c2_27 = arith.constant 2 : index
    %49 = memref.load %arg3[%c2_27] : memref<5xf32, #tpu.memory_space<smem>>
    %50 = vector.broadcast %49 : f32 to vector<8x128xf32>
    %51 = arith.addf %48, %50 : vector<8x128xf32>
    %cst_28 = arith.constant 0.000000e+00 : f32
    %52 = vector.broadcast %cst_28 : f32 to vector<8x128xf32>
    %53 = arith.maximumf %51, %52 : vector<8x128xf32>
    %c3 = arith.constant 3 : index
    %c0_29 = arith.constant 0 : index
    %54 = memref.load %arg2[%c3, %c0_29] : memref<5x3xf32, #tpu.memory_space<smem>>
    %55 = vector.broadcast %54 : f32 to vector<8x128xf32>
    %56 = arith.mulf %55, %1 : vector<8x128xf32>
    %c3_30 = arith.constant 3 : index
    %c1_31 = arith.constant 1 : index
    %57 = memref.load %arg2[%c3_30, %c1_31] : memref<5x3xf32, #tpu.memory_space<smem>>
    %58 = vector.broadcast %57 : f32 to vector<8x128xf32>
    %59 = arith.mulf %58, %3 : vector<8x128xf32>
    %60 = arith.addf %56, %59 : vector<8x128xf32>
    %c3_32 = arith.constant 3 : index
    %c2_33 = arith.constant 2 : index
    %61 = memref.load %arg2[%c3_32, %c2_33] : memref<5x3xf32, #tpu.memory_space<smem>>
    %62 = vector.broadcast %61 : f32 to vector<8x128xf32>
    %63 = arith.mulf %62, %5 : vector<8x128xf32>
    %64 = arith.addf %60, %63 : vector<8x128xf32>
    %c3_34 = arith.constant 3 : index
    %65 = memref.load %arg3[%c3_34] : memref<5xf32, #tpu.memory_space<smem>>
    %66 = vector.broadcast %65 : f32 to vector<8x128xf32>
    %67 = arith.addf %64, %66 : vector<8x128xf32>
    %cst_35 = arith.constant 0.000000e+00 : f32
    %68 = vector.broadcast %cst_35 : f32 to vector<8x128xf32>
    %69 = arith.maximumf %67, %68 : vector<8x128xf32>
    %c4 = arith.constant 4 : index
    %c0_36 = arith.constant 0 : index
    %70 = memref.load %arg2[%c4, %c0_36] : memref<5x3xf32, #tpu.memory_space<smem>>
    %71 = vector.broadcast %70 : f32 to vector<8x128xf32>
    %72 = arith.mulf %71, %1 : vector<8x128xf32>
    %c4_37 = arith.constant 4 : index
    %c1_38 = arith.constant 1 : index
    %73 = memref.load %arg2[%c4_37, %c1_38] : memref<5x3xf32, #tpu.memory_space<smem>>
    %74 = vector.broadcast %73 : f32 to vector<8x128xf32>
    %75 = arith.mulf %74, %3 : vector<8x128xf32>
    %76 = arith.addf %72, %75 : vector<8x128xf32>
    %c4_39 = arith.constant 4 : index
    %c2_40 = arith.constant 2 : index
    %77 = memref.load %arg2[%c4_39, %c2_40] : memref<5x3xf32, #tpu.memory_space<smem>>
    %78 = vector.broadcast %77 : f32 to vector<8x128xf32>
    %79 = arith.mulf %78, %5 : vector<8x128xf32>
    %80 = arith.addf %76, %79 : vector<8x128xf32>
    %c4_41 = arith.constant 4 : index
    %81 = memref.load %arg3[%c4_41] : memref<5xf32, #tpu.memory_space<smem>>
    %82 = vector.broadcast %81 : f32 to vector<8x128xf32>
    %83 = arith.addf %80, %82 : vector<8x128xf32>
    %cst_42 = arith.constant 0.000000e+00 : f32
    %84 = vector.broadcast %cst_42 : f32 to vector<8x128xf32>
    %85 = arith.maximumf %83, %84 : vector<8x128xf32>
    %c0_43 = arith.constant 0 : index
    %c0_44 = arith.constant 0 : index
    %86 = memref.load %arg4[%c0_43, %c0_44] : memref<2x5xf32, #tpu.memory_space<smem>>
    %87 = vector.broadcast %86 : f32 to vector<8x128xf32>
    %88 = arith.mulf %87, %21 : vector<8x128xf32>
    %c0_45 = arith.constant 0 : index
    %c1_46 = arith.constant 1 : index
    %89 = memref.load %arg4[%c0_45, %c1_46] : memref<2x5xf32, #tpu.memory_space<smem>>
    %90 = vector.broadcast %89 : f32 to vector<8x128xf32>
    %91 = arith.mulf %90, %37 : vector<8x128xf32>
    %92 = arith.addf %88, %91 : vector<8x128xf32>
    %c0_47 = arith.constant 0 : index
    %c2_48 = arith.constant 2 : index
    %93 = memref.load %arg4[%c0_47, %c2_48] : memref<2x5xf32, #tpu.memory_space<smem>>
    %94 = vector.broadcast %93 : f32 to vector<8x128xf32>
    %95 = arith.mulf %94, %53 : vector<8x128xf32>
    %96 = arith.addf %92, %95 : vector<8x128xf32>
    %c0_49 = arith.constant 0 : index
    %c3_50 = arith.constant 3 : index
    %97 = memref.load %arg4[%c0_49, %c3_50] : memref<2x5xf32, #tpu.memory_space<smem>>
    %98 = vector.broadcast %97 : f32 to vector<8x128xf32>
    %99 = arith.mulf %98, %69 : vector<8x128xf32>
    %100 = arith.addf %96, %99 : vector<8x128xf32>
    %c0_51 = arith.constant 0 : index
    %c4_52 = arith.constant 4 : index
    %101 = memref.load %arg4[%c0_51, %c4_52] : memref<2x5xf32, #tpu.memory_space<smem>>
    %102 = vector.broadcast %101 : f32 to vector<8x128xf32>
    %103 = arith.mulf %102, %85 : vector<8x128xf32>
    %104 = arith.addf %100, %103 : vector<8x128xf32>
    %c0_53 = arith.constant 0 : index
    %105 = memref.load %arg5[%c0_53] : memref<2xf32, #tpu.memory_space<smem>>
    %106 = vector.broadcast %105 : f32 to vector<8x128xf32>
    %107 = arith.addf %104, %106 : vector<8x128xf32>
    %cst_54 = arith.constant 5.000000e-01 : f32
    %108 = vector.broadcast %cst_54 : f32 to vector<8x128xf32>
    %109 = arith.mulf %108, %107 : vector<8x128xf32>
    %110 = math.tanh %109 : vector<8x128xf32>
    %cst_55 = arith.constant 5.000000e-01 : f32
    %111 = vector.broadcast %cst_55 : f32 to vector<8x128xf32>
    %112 = arith.mulf %111, %110 : vector<8x128xf32>
    %cst_56 = arith.constant 5.000000e-01 : f32
    %113 = vector.broadcast %cst_56 : f32 to vector<8x128xf32>
    %114 = arith.addf %112, %113 : vector<8x128xf32>
    %c0_57 = arith.constant 0 : index
    %c0_58 = arith.constant 0 : index
    %c0_59 = arith.constant 0 : index
    %115 = vector.load %arg6[%c0_57, %c0_58, %c0_59] : memref<2x8x128xf32, #tpu.memory_space<vmem>>, vector<1x8x128xf32>
    %116 = vector.shape_cast %115 : vector<1x8x128xf32> to vector<8x128xf32>
    %117 = vector.shape_cast %114 : vector<8x128xf32> to vector<1x8x128xf32>
    tpu.vector_store %arg6[%c0_57, %c0_58, %c0_59], %117 {strides = array<i32>} : memref<2x8x128xf32, #tpu.memory_space<vmem>>, vector<1x8x128xf32>,
    %c1_60 = arith.constant 1 : index
    %c0_61 = arith.constant 0 : index
    %118 = memref.load %arg4[%c1_60, %c0_61] : memref<2x5xf32, #tpu.memory_space<smem>>
    %119 = vector.broadcast %118 : f32 to vector<8x128xf32>
    %120 = arith.mulf %119, %21 : vector<8x128xf32>
    %c1_62 = arith.constant 1 : index
    %c1_63 = arith.constant 1 : index
    %121 = memref.load %arg4[%c1_62, %c1_63] : memref<2x5xf32, #tpu.memory_space<smem>>
    %122 = vector.broadcast %121 : f32 to vector<8x128xf32>
    %123 = arith.mulf %122, %37 : vector<8x128xf32>
    %124 = arith.addf %120, %123 : vector<8x128xf32>
    %c1_64 = arith.constant 1 : index
    %c2_65 = arith.constant 2 : index
    %125 = memref.load %arg4[%c1_64, %c2_65] : memref<2x5xf32, #tpu.memory_space<smem>>
    %126 = vector.broadcast %125 : f32 to vector<8x128xf32>
    %127 = arith.mulf %126, %53 : vector<8x128xf32>
    %128 = arith.addf %124, %127 : vector<8x128xf32>
    %c1_66 = arith.constant 1 : index
    %c3_67 = arith.constant 3 : index
    %129 = memref.load %arg4[%c1_66, %c3_67] : memref<2x5xf32, #tpu.memory_space<smem>>
    %130 = vector.broadcast %129 : f32 to vector<8x128xf32>
    %131 = arith.mulf %130, %69 : vector<8x128xf32>
    %132 = arith.addf %128, %131 : vector<8x128xf32>
    %c1_68 = arith.constant 1 : index
    %c4_69 = arith.constant 4 : index
    %133 = memref.load %arg4[%c1_68, %c4_69] : memref<2x5xf32, #tpu.memory_space<smem>>
    %134 = vector.broadcast %133 : f32 to vector<8x128xf32>
    %135 = arith.mulf %134, %85 : vector<8x128xf32>
    %136 = arith.addf %132, %135 : vector<8x128xf32>
    %c1_70 = arith.constant 1 : index
    %137 = memref.load %arg5[%c1_70] : memref<2xf32, #tpu.memory_space<smem>>
    %138 = vector.broadcast %137 : f32 to vector<8x128xf32>
    %139 = arith.addf %136, %138 : vector<8x128xf32>
    %cst_71 = arith.constant 5.000000e-01 : f32
    %140 = vector.broadcast %cst_71 : f32 to vector<8x128xf32>
    %141 = arith.mulf %140, %139 : vector<8x128xf32>
    %142 = math.tanh %141 : vector<8x128xf32>
    %cst_72 = arith.constant 5.000000e-01 : f32
    %143 = vector.broadcast %cst_72 : f32 to vector<8x128xf32>
    %144 = arith.mulf %143, %142 : vector<8x128xf32>
    %cst_73 = arith.constant 5.000000e-01 : f32
    %145 = vector.broadcast %cst_73 : f32 to vector<8x128xf32>
    %146 = arith.addf %144, %145 : vector<8x128xf32>
    %c1_74 = arith.constant 1 : index
    %c0_75 = arith.constant 0 : index
    %c0_76 = arith.constant 0 : index
    %147 = vector.load %arg6[%c1_74, %c0_75, %c0_76] : memref<2x8x128xf32, #tpu.memory_space<vmem>>, vector<1x8x128xf32>
    %148 = vector.shape_cast %147 : vector<1x8x128xf32> to vector<8x128xf32>
    %149 = vector.shape_cast %146 : vector<8x128xf32> to vector<1x8x128xf32>
    tpu.vector_store %arg6[%c1_74, %c0_75, %c0_76], %149 {strides = array<i32>} : memref<2x8x128xf32, #tpu.memory_space<vmem>>, vector<1x8x128xf32>,
    return
  }
  func.func @transform_0(%arg0: i32) -> (i32, i32, i32) {
    %c0_i32 = arith.constant 0 : i32
    %c0_i32_0 = arith.constant 0 : i32
    %c0_i32_1 = arith.constant 0 : i32
    return %c0_i32, %arg0, %c0_i32_0 : i32, i32, i32
  }
  func.func @transform_1(%arg0: i32) -> (i32, i32) {
    %c0_i32 = arith.constant 0 : i32
    %c0_i32_0 = arith.constant 0 : i32
    %c0_i32_1 = arith.constant 0 : i32
    return %c0_i32, %c0_i32_0 : i32, i32
  }
  func.func @transform_2(%arg0: i32) -> i32 {
    %c0_i32 = arith.constant 0 : i32
    %c0_i32_0 = arith.constant 0 : i32
    return %c0_i32 : i32
  }
  func.func @transform_3(%arg0: i32) -> (i32, i32) {
    %c0_i32 = arith.constant 0 : i32
    %c0_i32_0 = arith.constant 0 : i32
    %c0_i32_1 = arith.constant 0 : i32
    return %c0_i32, %c0_i32_0 : i32, i32
  }
  func.func @transform_4(%arg0: i32) -> i32 {
    %c0_i32 = arith.constant 0 : i32
    %c0_i32_0 = arith.constant 0 : i32
    return %c0_i32 : i32
  }
  func.func @transform_5(%arg0: i32) -> (i32, i32, i32) {
    %c0_i32 = arith.constant 0 : i32
    %c0_i32_0 = arith.constant 0 : i32
    %c0_i32_1 = arith.constant 0 : i32
    return %c0_i32, %arg0, %c0_i32_0 : i32, i32, i32
  }
}

</mosaic_0001>

<bundles_post_ra>
// kernel: tpu_custom_call.1
= control target key start
LH: loop header
LB: loop body
LE: loop exit
PB: predicated region body
PF: predicated region fallthrough
CT: control target
= control target key end

     0   :  { %s1242_s0 = inlined_call_operand.hbm [shape: f32[3,24,128], index: 0, kind: input, shape index: {}]   ;;  %s1243_s1 = inlined_call_operand.vmem [shape: f32[5,3], index: 1, kind: input, shape index: {}]   ;;  %s1244_s2 = inlined_call_operand.vmem [shape: f32[5], index: 2, kind: input, shape index: {}]   ;;  %s1245_s3 = inlined_call_operand.vmem [shape: f32[2,5], index: 3, kind: input, shape index: {}]   ;;  %s1246_s4 = inlined_call_operand.vmem [shape: f32[2], index: 4, kind: input, shape index: {}]   ;;  %s1247_s5 = inlined_call_operand.hbm [shape: f32[2,24,128], index: 5, kind: output, shape index: {}]  }
   0x1   :  { %1251 = sst [smem:[#allocation18_spill]] %s1242_s0 }
   0x2   :  { %10 = vsyncpa [#allocation3], 0 }
   0x3   :  { %12 = vsyncpa [#allocation3 + $0x1], 0 }
   0x4   :  { %13 = vsyncpa [#allocation5], 0 }
   0x5   :  { %14 = vsyncpa [#allocation8], 0 }
   0x6   :  { %15 = vsyncpa [#allocation11], 0 }
   0x7   :  { %16 = vsyncpa [#allocation4], 0 }
   0x8   :  { %18 = vsyncpa [#allocation4 + $0x1], 0  ;;  %s916_s18 = smov 0   ;;  %s918_s19 = smov 0  }
   0x9   :  { %s920_s20 = smov 0   ;;  %s922_s21 = smov 0  }
   0xa LB: > { %s937_s22 = sadd.s32 4294967295, %s872_s21   ;;  %s556_s23 = sadd.s32 4294967294, %s872_s21   ;;  %s872_s21 = sphi %s922_s21, %s1272_s21   ;;  %s868_s20 = sphi %s920_s20, %s1271_s20   ;;  %s864_s19 = sphi %s918_s19, %s1270_s19   ;;  %s860_s18 = sphi %s916_s18, %s1269_s18  }
   0xb   : > { %p44_p0 = scmp.ne.s32.totalorder %s864_s19, %s860_s18  ;;  %p1248_p1 = scmp.eq.s32.totalorder %s937_s22, 0 }
   0xc   : > { %p158_p3 = scmp.eq.s32.totalorder %s556_s23, 2  ;;  %p557_p5 = scmp.ge.s32.totalorder %s872_s21, 1 }
   0xd   : > { %p946_p4 = por %p1248_p1, %p44_p0  ;;  %p165_p7 = scmp.lt.s32.totalorder %s872_s21, 4 }
   0xe   : > { %p951_p6 = por %p158_p3, %p44_p0  ;;  %s189_s28 = sshll.u32 %s1244_s2, 4  ;;  %s190_s28 = int_to_ptr.vmem [resolvable:$true] %s189_s28 }
   0xf   : > { %s1252_s24 = scalar_select %p946_p4, 1, 0 }
  0x10   : > { %s1253_s25 = scalar_select %p951_p6, 1, 0 }
  0x11   : > { %p959_p8 = pnand %p557_p5, %p165_p7  ;;  %s178_s7 = sshll.u32 %s1243_s1, 4  ;;  %s179_s7 = int_to_ptr.vmem [resolvable:$true] %s178_s7 }
  0x12   : > { %s200_s11 = sshll.u32 %s1245_s3, 4  ;;  %s211_s14 = sshll.u32 %s1246_s4, 4  ;;  %s977_s11 = int_to_ptr.vmem [resolvable:$true] %s200_s11  ;;  %s212_s14 = int_to_ptr.vmem [resolvable:$true] %s211_s14 }
  0x13   : > { %s1254_s29 = scalar_select %p959_p8, 1, 0 }
  0x14   : > { %p627_p9 = pneg %p959_p8  ;;  %s704_s15 = scalar_lea.vmem %s190_s28, 16 }
  0x15   : > { %p705_p11 = scmp.ne.s32.totalorder %s190_s28, %s704_s15  ;;  %p712_p3 = scmp.lt.s32.totalorder %s190_s28, %s190_s28 }
  0x16   : > { %p970_p10 = pnand %p627_p9, %p1248_p1  ;;  %p713_p5 = scmp.lt.s32.totalorder %s704_s15, %s704_s15 }
  0x18   : > { %p706_p12 = pneg %p970_p10  ;;  %p714_p7 = por %p713_p5, %p712_p3 }
  0x1a   : > { %p707_p13 = pnand %p706_p12, %p705_p11 }
  0x1c   : > { %p708_p0 = pneg %p707_p13 }
  0x1e   : > { %p715_p9 = pnand %p714_p7, %p708_p0 }
  0x20   : > { %718 = shalt.err (!%p715_p9)
}
  0x21   : > { %s874_s16 = smov [#allocation7]   ;;  %s719_s17 = scalar_lea.vmem %s179_s7, 128 }
  0x22   : > { %633 = dma.vmem_to_smem (!%p970_p10), %s190_s28, 16, %s874_s16, [#allocation8]  }
  0x23   : > { %p720_p1 = scmp.ne.s32.totalorder %s179_s7, %s719_s17  ;;  %p727_p4 = scmp.lt.s32.totalorder %s179_s7, %s179_s7 }
  0x24   : > { %p728_p8 = scmp.lt.s32.totalorder %s719_s17, %s719_s17 }
  0x25   : > { %p722_p2 = pnand %p720_p1, %p706_p12 }
  0x26   : > { %p729_p11 = por %p728_p8, %p727_p4 }
  0x27   : > { %p723_p6 = pneg %p722_p2 }
  0x29   : > { %p730_p13 = pnand %p729_p11, %p723_p6 }
  0x2b   : > { %733 = shalt.err (!%p730_p13)
}
  0x2c   : > { %s875_s23 = smov [#allocation6]   ;;  %s734_s26 = scalar_lea.vmem %s977_s11, 32 }
  0x2d   : > { %630 = dma.vmem_to_smem (!%p970_p10), %s179_s7, 128, %s875_s23, [#allocation5]  }
  0x2e   : > { %p735_p0 = scmp.ne.s32.totalorder %s977_s11, %s734_s26  ;;  %p742_p2 = scmp.lt.s32.totalorder %s977_s11, %s977_s11 }
  0x2f   : > { %p743_p5 = scmp.lt.s32.totalorder %s734_s26, %s734_s26 }
  0x30   : > { %p737_p3 = pnand %p735_p0, %p706_p12 }
  0x31   : > { %p744_p4 = por %p743_p5, %p742_p2 }
  0x32   : > { %p738_p1 = pneg %p737_p3 }
  0x34   : > { %p745_p6 = pnand %p744_p4, %p738_p1 }
  0x36   : > { %748 = shalt.err (!%p745_p6)
}
  0x37   : > { %s876_s27 = smov [#allocation9]   ;;  %s749_s6 = scalar_lea.vmem %s212_s14, 16 }
  0x38   : > { %636 = dma.vmem_to_smem (!%p970_p10), %s977_s11, 32, %s876_s27, [#allocation8]  }
  0x39   : > { %p750_p8 = scmp.ne.s32.totalorder %s212_s14, %s749_s6  ;;  %p757_p11 = scmp.lt.s32.totalorder %s212_s14, %s212_s14 }
  0x3a   : > { %p758_p13 = scmp.lt.s32.totalorder %s749_s6, %s749_s6 }
  0x3b   : > { %p752_p7 = pnand %p750_p8, %p706_p12 }
  0x3c   : > { %p759_p0 = por %p758_p13, %p757_p11 }
  0x3d   : > { %p753_p9 = pneg %p752_p7 }
  0x3f   : > { %p760_p3 = pnand %p759_p0, %p753_p9 }
  0x41   : > { %763 = shalt.err (!%p760_p3)
}
  0x42   : > { %s877_s7 = smov [#allocation10]   ;;  %s1014_s9 = sadd.s32 1, %s872_s21  }
  0x43   : > { %639 = dma.vmem_to_smem (!%p970_p10), %s212_s14, 16, %s877_s7, [#allocation11]  }
  0x44   : > { %s28_s10 = ssub.s32 %s872_s21, %s1014_s9  ;;  %s31_s11 = sadd.s32 1, %s868_s20 }
  0x45   : > { %p29_p12 = scmp.eq.s32.totalorder %s28_s10, 0  ;;  %p38_p1 = scmp.ne.s32.totalorder %s868_s20, %s864_s19 }
  0x46   : > { %p39_p2 = scmp.eq.s32.totalorder %s872_s21, 0  ;;  %p1256_p4 = scmp.eq.s32.totalorder %s937_s22, 2 }
  0x47   : > { %s1023_s8 = scalar_select %p29_p12, %s868_s20, %s31_s11  }
  0x48   : > { %p40_p5 = por %p39_p2, %p38_p1  ;;  %p1027_p6 = por %p1256_p4, %p38_p1 }
  0x49   : > { %p652_p8 = scmp.lt.s32.totalorder %s872_s21, 3  ;;  %s222_s13 = sand.u32 1, %s868_s20  }
  0x4a   : > { %s605_s15 = smul.u32 24, %s222_s13  ;;  %s563_s14 = sshll.u32 %s872_s21, 7 }
  0x4b   : > { %p1034_p10 = pnand %p652_p8, %p40_p5  ;;  %s1259_s0 = sld [smem:[#allocation18_spill]] }
  0x4c   : > { %s226_s27 = scalar_lea.vmem [#allocation2], %s605_s15  ;;  %s1045_s30 = scalar_lea.sflag [#allocation3], %s222_s13 }
  0x4d   : > { %s232_s28 = sshll.u32 %s226_s27, 4  ;;  %p766_p9 = pneg %p1034_p10  ;;  %s1043_s28 = int_to_ptr.vmem [resolvable:$true] %s232_s28 }
  0x51   : > { %s1041_s26 = scalar_lea.hbm %s1259_s0, %s563_s14  ;;  %s769_s11 = scalar_lea.hbm %s1259_s0, 1152 }
  0x52   : > { %s764_s6 = scalar_lea.hbm %s1041_s26, 384  ;;  %p770_p0 = scmp.lt.u32.totalorder %s1041_s26, %s1259_s0 }
  0x53   : > { %p765_p7 = scmp.ne.s32.totalorder %s1041_s26, %s764_s6  ;;  %p771_p3 = scmp.lt.u32.totalorder %s769_s11, %s764_s6 }
  0x54   : > { %p773_p1 = scmp.lt.u32.totalorder %s764_s6, %s1041_s26 }
  0x55   : > { %p767_p11 = pnand %p766_p9, %p765_p7  ;;  %p772_p12 = por %p771_p3, %p770_p0 }
  0x57   : > { %p768_p13 = pneg %p767_p11  ;;  %p774_p2 = por %p773_p1, %p772_p12 }
  0x59   : > { %p775_p5 = pnand %p774_p2, %p768_p13 }
  0x5b   : > { %778 = shalt.err (!%p775_p5)
}
  0x5c   : > { %s779_s13 = scalar_lea.vmem %s1043_s28, 384  ;;  %s878_s15 = smov [#allocation2]  }
  0x5d   : > { %p780_p4 = scmp.ne.s32.totalorder %s1043_s28, %s779_s13  ;;  %s784_s23 = sshll.u32 %s878_s15, 4  ;;  %s785_s23 = int_to_ptr.vmem [resolvable:$false] %s784_s23 }
  0x5e   : > { %s786_s27 = scalar_lea.vmem %s785_s23, 768  ;;  %p787_p11 = scmp.lt.s32.totalorder %s1043_s28, %s785_s23 }
  0x5f   : > { %p782_p8 = pnand %p780_p4, %p766_p9  ;;  %p788_p0 = scmp.lt.s32.totalorder %s786_s27, %s779_s13 }
  0x61   : > { %p783_p7 = pneg %p782_p8  ;;  %p789_p3 = por %p788_p0, %p787_p11 }
  0x63   : > { %p790_p12 = pnand %p789_p3, %p783_p7 }
  0x65   : > { %793 = shalt.err (!%p790_p12)
}
  0x66   : > { %s879_s6 = smov 384   ;;  %s880_s7 = smov 128  }
  0x67   : > { %s881_s10 = smov 8   ;;  %p1260_p9 = scmp.ne.s32.totalorder %s1254_s29, 0 }
  0x68   : > { %643 = dma.hbm_to_vmem [thread:$0]  (!%p1034_p10), %s1041_s26, 384, %s1043_s28, %s1045_s30, %s879_s6, %s880_s7, %s881_s10  }
  0x69   : > { %244 = sbr.rel (%p1260_p9) target bundleno = 193 (0xc1), region = 40  ;;  %s1076_s11 = sand.u32 (!%p1260_p9), 1, %s864_s19  }
  0x6a   : > { %s606_s14 = smul.u32 (!%p1260_p9), 24, %s1076_s11  ;;  %s247_s17 = scalar_lea.sflag (!%p1260_p9), [#allocation3], %s1076_s11 }
  0x6b   : > { %p1261_p13 = scmp.ne.s32.totalorder (!%p1260_p9), %s1252_s24, 0 }
  0x6c   : > { %s250_s13 = scalar_lea.vmem (!%p1260_p9), [#allocation2], %s606_s14 }
  0x70   : > { %839 = dma.done.wait (%p1261_p13), %s247_s17, 384  }
  0x71   : > { %841 = vsyncadd (%p1261_p13), %s247_s17, 4294966912  ;;  %p1262_p1 = scmp.eq.s32.totalorder %s937_s22, 0 }
  0x73   : > { %843 = dma.done.wait (%p1262_p1), [#allocation5], 128   ;;  %p1263_p10 = pmov %p1262_p1 }
  0x74   : > { %p1264_p2 = pmov %p1262_p1 }
  0x75   : > { %845 = vsyncadd (%p1263_p10), [#allocation5], 4294967168 }
  0x76   : > { %847 = dma.done.wait (%p1264_p2), [#allocation8], 48   ;;  %p1265_p5 = pmov %p1262_p1 }
  0x77   : > { %p1266_p4 = pmov %p1262_p1 }
  0x78   : > { %849 = vsyncadd (%p1265_p5), [#allocation8], 4294967248 }
  0x79   : > { %851 = dma.done.wait (%p1266_p4), [#allocation11], 16   ;;  %p1267_p8 = pmov %p1262_p1 }
  0x7b   : > { %853 = vsyncadd (%p1267_p8), [#allocation11], 4294967280 }
  0x7c   : > { %271 = sfence }
  0x7d   : > { %s299_s24 = sld [smem:[#allocation6]]  ;;  %s572_s29 = sld [smem:[#allocation6 + $0x1]]  ;;  %v1098_v0 = vld [vmem:[%s250_s13] sm:$0xff]  ;;  %v1102_v1 = vld [vmem:[%s250_s13 + $0x8] sm:$0xff]  ;;  %v1108_v2 = vld [vmem:[%s250_s13 + $0x10] sm:$0xff] }
  0x7e   : > { %s573_s16 = sld [smem:[#allocation6 + $0x2]]  ;;  %s1096_s26 = sld [smem:[#allocation7]] }
  0x7f   : > { %s574_s28 = sld [smem:[#allocation6 + $0x80]]  ;;  %s575_s30 = sld [smem:[#allocation6 + $0x81]] }
  0x80   : > { %s576_s15 = sld [smem:[#allocation6 + $0x82]]  ;;  %s1100_s23 = sld [smem:[#allocation7 + $0x1]] }
  0x81   : > { %s1104_s27 = sld [smem:[#allocation6 + $0x100]]  ;;  %s1106_s6 = sld [smem:[#allocation6 + $0x101]] }
  0x82   : > { %s1110_s7 = sld [smem:[#allocation6 + $0x102]]  ;;  %s1115_s14 = sld [smem:[#allocation6 + $0x180]] }
  0x83   : > { %v300_v3 = vstv %s299_s24  ;;  %s1112_s10 = sld [smem:[#allocation7 + $0x2]]  ;;  %v303_v5 = vstv %s572_s29  ;;  %s1117_s17 = sld [smem:[#allocation6 + $0x181]] }
  0x84   : > { %v301_v4 = vmul.f32 %v300_v3, %v1098_v0  ;;  %v304_v6 = vmul.f32 %v1102_v1, %v303_v5  ;;  %v307_v7 = vstv %s573_s16  ;;  %s1120_s0 = sld [smem:[#allocation6 + $0x182]]  ;;  %s1122_s13 = sld [smem:[#allocation7 + $0x3]]  ;;  %v311_v9 = vstv %s1096_s26 }
  0x85   : > { %v308_v8 = vmul.f32 %v1108_v2, %v307_v7  ;;  %v315_v10 = vstv %s574_s28  ;;  %v318_v11 = vstv %s575_s30  ;;  %s1126_s24 = sld [smem:[#allocation6 + $0x200]]  ;;  %s1128_s29 = sld [smem:[#allocation6 + $0x201]] }
  0x86   : > { %v305_v12 = vadd.f32 %v304_v6, %v301_v4  ;;  %v316_v13 = vmul.f32 %v315_v10, %v1098_v0  ;;  %v319_v14 = vmul.f32 %v1102_v1, %v318_v11  ;;  %v322_v15 = vstv %s576_s15  ;;  %s1132_s16 = sld [smem:[#allocation6 + $0x202]]  ;;  %s1138_s26 = sld [smem:[#allocation9]] }
  0x87   : > { %v323_v16 = vmul.f32 %v1108_v2, %v322_v15  ;;  %v326_v17 = vstv %s1100_s23  ;;  %v330_v18 = vstv %s1104_s27  ;;  %v333_v19 = vstv %s1106_s6  ;;  %s1142_s28 = sld [smem:[#allocation9 + $0x1]]  ;;  %s1148_s30 = sld [smem:[#allocation7 + $0x4]] }
  0x88   : > { %v309_v20 = vadd.f32 %v308_v8, %v305_v12  ;;  %v320_v21 = vadd.f32 %v319_v14, %v316_v13  ;;  %v331_v22 = vmul.f32 %v330_v18, %v1098_v0  ;;  %v334_v23 = vmul.f32 %v1102_v1, %v333_v19  ;;  %s1150_s15 = sld [smem:[#allocation9 + $0x2]]  ;;  %s1153_s23 = sld [smem:[#allocation9 + $0x3]] }
  0x89   : > { %v337_v24 = vstv %s1110_s7  ;;  %v341_v25 = vstv %s1112_s10  ;;  %v345_v26 = vstv %s1115_s14  ;;  %v348_v27 = vstv %s1117_s17  ;;  %s1155_s27 = sld [smem:[#allocation9 + $0x4]]  ;;  %s1161_s6 = sld [smem:[#allocation9 + $0x80]] }
  0x8a   : > { %v312_v28 = vadd.f32 %v311_v9, %v309_v20  ;;  %v324_v29 = vadd.f32 %v323_v16, %v320_v21  ;;  %v335_v30 = vadd.f32 %v334_v23, %v331_v22  ;;  %v338_v31 = vmul.f32 %v1108_v2, %v337_v24  ;;  %s1163_s7 = sld [smem:[#allocation9 + $0x81]]  ;;  %s1166_s10 = sld [smem:[#allocation9 + $0x82]] }
  0x8b   : > { %v346_v32 = vmul.f32 %v345_v26, %v1098_v0  ;;  %v349_v33 = vmul.f32 %v1102_v1, %v348_v27  ;;  %v352_v34 = vstv %s1120_s0  ;;  %v356_v35 = vstv %s1122_s13  ;;  %s1171_s0 = sld [smem:[#allocation9 + $0x83]]  ;;  %s1175_s14 = sld [smem:[#allocation9 + $0x84]] }
  0x8c   : > { %v313_v36 = vmax.f32 %v312_v28, 0.0  ;;  %v327_v37 = vadd.f32 %v326_v17, %v324_v29  ;;  %v339_v38 = vadd.f32 %v338_v31, %v335_v30  ;;  %v353_v39 = vmul.f32 %v1108_v2, %v352_v34  ;;  %s1182_s17 = sld [smem:[#allocation10]]  ;;  %s599_s13 = sld [smem:[#allocation10 + $0x1]] }
  0x8d   : > { %v350_v40 = vadd.f32 %v349_v33, %v346_v32  ;;  %v360_v41 = vstv %s1126_s24  ;;  %v363_v42 = vstv %s1128_s29  ;;  %v367_v43 = vstv %s1132_s16  ;;  %s569_s24 = sshll.u32 %s1076_s11, 4 }
  0x8e   : > { %v328_v44 = vmax.f32 %v327_v37, 0.0  ;;  %v342_v45 = vadd.f32 %v341_v25, %v339_v38  ;;  %v361_v46 = vmul.f32 %v360_v41, %v1098_v0  ;;  %v364_v47 = vmul.f32 %v1102_v1, %v363_v42  ;;  %s293_s29 = scalar_lea.vmem [#allocation12], %s569_s24 }
  0x8f   : > { %v354_v48 = vadd.f32 %v353_v39, %v350_v40  ;;  %v368_v49 = vmul.f32 %v1108_v2, %v367_v43  ;;  %v375_v50 = vstv %s1138_s26  ;;  %v378_v54 = vstv %s1142_s28  ;;  %s442_s16 = sshll.u32 %s293_s29, 4  ;;  %s602_s26 = sshll.u32 %s937_s22, 7  ;;  %s1194_s16 = int_to_ptr.vmem [resolvable:$true] %s442_s16 }
  0x90   : > { %v343_v51 = vmax.f32 %v342_v45, 0.0  ;;  %v365_v52 = vadd.f32 %v364_v47, %v361_v46  ;;  %v376_v53 = vmul.f32 %v375_v50, %v313_v36  ;;  %v371_v56 = vstv %s1148_s30  ;;  %s882_s22 = smov [#allocation12]  }
  0x91   : > { %v357_v55 = vadd.f32 %v356_v35, %v354_v48  ;;  %v379_v57 = vmul.f32 %v378_v54, %v328_v44  ;;  %v382_v58 = vstv %s1150_s15  ;;  %v386_v61 = vstv %s1153_s23  ;;  %s1199_s15 = scalar_lea.hbm %s1247_s5, %s602_s26  ;;  %s430_s23 = scalar_lea.sflag [#allocation4], %s1076_s11 }
  0x92   : > { %v369_v59 = vadd.f32 %v368_v49, %v365_v52  ;;  %v383_v60 = vmul.f32 %v382_v58, %v343_v51  ;;  %v390_v62 = vstv %s1155_s27  ;;  %v402_v1 = vstv %s1161_s6  ;;  %s794_s27 = scalar_lea.vmem %s1194_s16, 256  ;;  %s798_s6 = sshll.u32 %s882_s22, 4  ;;  %s799_s6 = int_to_ptr.vmem [resolvable:$false] %s798_s6 }
  0x93   : > { %v358_v63 = vmax.f32 %v357_v55, 0.0  ;;  %v380_v0 = vadd.f32 %v379_v57, %v376_v53  ;;  %v405_v2 = vstv %s1163_s7  ;;  %v403_v4 = vmul.f32 %v402_v1, %v313_v36  ;;  %p795_p7 = scmp.ne.s32.totalorder %s1194_s16, %s794_s27  ;;  %s800_s7 = scalar_lea.vmem %s799_s6, 512 }
  0x94   : > { %v372_v3 = vadd.f32 %v371_v56, %v369_v59  ;;  %v406_v5 = vmul.f32 %v405_v2, %v328_v44  ;;  %v409_v6 = vstv %s1166_s10  ;;  %v413_v10 = vstv %s1171_s0  ;;  %p801_p3 = scmp.lt.s32.totalorder %s1194_s16, %s799_s6  ;;  %p802_p12 = scmp.lt.s32.totalorder %s800_s7, %s794_s27 }
  0x95   : > { %v384_v7 = vadd.f32 %v383_v60, %v380_v0  ;;  %v387_v8 = vmul.f32 %v386_v61, %v358_v63  ;;  %v410_v9 = vmul.f32 %v409_v6, %v343_v51  ;;  %v414_v13 = vmul.f32 %v413_v10, %v358_v63  ;;  %p796_p11 = pnand %p795_p7, %p1027_p6 }
  0x96   : > { %v373_v11 = vmax.f32 %v372_v3, 0.0  ;;  %v407_v12 = vadd.f32 %v406_v5, %v403_v4  ;;  %v417_v14 = vstv %s1175_s14  ;;  %v394_v19 = vstv %s1182_s17  ;;  %p803_p9 = por %p802_p12, %p801_p3 }
  0x97   : > { %v388_v15 = vadd.f32 %v387_v8, %v384_v7  ;;  %v421_v22 = vstv %s599_s13  ;;  %p797_p0 = pneg %p796_p11 }
  0x98   : > { %v391_v16 = vmul.f32 %v390_v62, %v373_v11  ;;  %v411_v17 = vadd.f32 %v410_v9, %v407_v12  ;;  %v418_v18 = vmul.f32 %v417_v14, %v373_v11 }
  0x99   : > { %p804_p13 = pnand %p803_p9, %p797_p0 }
  0x9a   : > { %v392_v20 = vadd.f32 %v391_v16, %v388_v15  ;;  %v415_v21 = vadd.f32 %v414_v13, %v411_v17 }
  0x9c   : > { %v395_v23 = vadd.f32 %v394_v19, %v392_v20  ;;  %v419_v24 = vadd.f32 %v418_v18, %v415_v21 }
  0x9e   : > { %v396_v25 = vmul.f32 0.5, %v395_v23  ;;  %v422_v26 = vadd.f32 %v421_v22, %v419_v24 }
  0xa0   : > { %700 = vtanh.f32 %v396_v25  ;;  %v423_v27 = vmul.f32 0.5, %v422_v26 }
  0xa2   : > { %702 = vtanh.f32 %v423_v27 }
  0xaa   : > { %v701_v28 = vpop.eup %700 }
  0xab   : > { %v398_v29 = vmul.f32 0.5, %v701_v28 }
  0xac   : > { %v703_v30 = vpop.eup %702 }
  0xad   : > { %v399_v31 = vadd.f32 0.5, %v398_v29  ;;  %v425_v32 = vmul.f32 0.5, %v703_v30 }
  0xaf   : > { %400 = vst [vmem:[%s293_s29] sm:$0xff] %v399_v31  ;;  %v426_v33 = vadd.f32 0.5, %v425_v32 }
  0xb1   : > { %600 = vst [vmem:[%s293_s29 + $0x8] sm:$0xff] %v426_v33 }
  0xb2   : > { %807 = shalt.err (!%p804_p13)
}
  0xb3   : > { %s808_s10 = scalar_lea.hbm %s1199_s15, 256  ;;  %s812_s17 = scalar_lea.hbm %s1247_s5, 768 }
  0xb4   : > { %p809_p1 = scmp.ne.s32.totalorder %s1199_s15, %s808_s10  ;;  %p813_p5 = scmp.lt.u32.totalorder %s1199_s15, %s1247_s5 }
  0xb5   : > { %p814_p4 = scmp.lt.u32.totalorder %s812_s17, %s808_s10  ;;  %p816_p7 = scmp.lt.u32.totalorder %s808_s10, %s1199_s15 }
  0xb6   : > { %p810_p10 = pnand %p809_p1, %p1027_p6 }
  0xb7   : > { %p815_p8 = por %p814_p4, %p813_p5 }
  0xb8   : > { %p811_p2 = pneg %p810_p10 }
  0xb9   : > { %p817_p11 = por %p816_p7, %p815_p8 }
  0xbb   : > { %p818_p0 = pnand %p817_p11, %p811_p2 }
  0xbd   : > { %821 = shalt.err (!%p818_p0)
}
  0xbe   : > { %s883_s29 = smov 128   ;;  %s884_s26 = smov 384  }
  0xbf   : > { %s885_s28 = smov 8  }
  0xc0   : > { %625 = dma.vmem_to_hbm [thread:$0]  (%p1027_p6), %s1194_s16, 256, %s1199_s15, %s430_s23, %s883_s29, %s884_s26, %s885_s28  }
  0xc1 PF: > { %p657_p3 = scmp.ge.s32.totalorder %s872_s21, 2  ;;  %s457_s30 = sand.u32 1, %s860_s18  }
  0xc2   : > { %p1268_p12 = scmp.ne.s32.totalorder %s1253_s25, 0  ;;  %s458_s27 = scalar_lea.sflag [#allocation4], %s457_s30 }
  0xc4   : > { %p645_p9 = pnand %p657_p3, %p1268_p12 }
  0xc6   : > { %855 = dma.done.wait (!%p645_p9), %s458_s27, 256  }
  0xc7   : > { %857 = vsyncadd (!%p645_p9), %s458_s27, 4294967040  ;;  %p21_p13 = scmp.ge.s32.totalorder %s1014_s9, 5   ;;  %s1269_s18 = smov %s864_s19 }
  0xc8   : > { %s1270_s19 = smov %s868_s20  ;;  %s1271_s20 = smov %s1023_s8 }
  0xc9   : > { %s1272_s21 = smov %s1014_s9  ;;  %23 = sbr.rel (!%p21_p13) target bundleno = 10 (0xa), region = 105 }
  0xd0   :  { %463 = vsyncpa [#allocation3], 1 }
  0xd1   :  { %465 = vsyncpa [#allocation3 + $0x1], 1 }
  0xd2   :  { %466 = vsyncpa [#allocation4], 1 }
  0xd3   :  { %468 = vsyncpa [#allocation4 + $0x1], 1 }
  0xd4   :  { %469 = vsyncpa [#allocation5], 1 }
  0xd5   :  { %471 = vsyncpa [#allocation5 + $0x1], 1 }
  0xd6   :  { %472 = vsyncpa [#allocation8], 1 }
  0xd7   :  { %473 = vsyncpa [#allocation11], 1 }

</bundles_post_ra>
